<compile_context>
chip_gen: v6e
topology: v6e:2x2x1
jax: 0.10.0
libtpu: 0.0.40
codegen_flags: <defaults>
</compile_context>

<pallas_src>
import jax
import jax.numpy as jnp
from jax import lax
from jax.experimental import pallas as pl
from jax.experimental.pallas import tpu as pltpu

_LANES = 128     # vreg lane width
_SUBLANES = 8    # f32 sublane count


def _probability_kernel(x_ref, w_ref, b_ref, o_ref):
    # x_ref: [TB, D]      w_ref: [D, Mp] (canonical [K, N] MXU layout)
    # b_ref: [1, Mp]      o_ref: [TB, M] (only the useful columns go to HBM)
    logits = lax.dot_general(
        x_ref[...], w_ref[...],
        dimension_numbers=(((1,), (0,)), ((), ())),
        preferred_element_type=jnp.float32,
    )
    logits = logits + b_ref[...]                 # broadcast [1, Mp] over batch
    m = o_ref.shape[1]                           # static true n_primitives
    # sigmoid's exp lands on the EUP slot; only the M useful lanes are stored.
    o_ref[...] = jax.nn.sigmoid(logits[:, :m]).astype(o_ref.dtype)


def prepare_probability_params(weight, bias):
    """One-time parameter preparation (hoist out of the per-call path).

    weight: [M, D] float32 (PyTorch nn.Linear convention)
    bias:   [M]    float32
    returns (w_dmp [D, Mp], b_1mp [1, Mp], M) with Mp = n_primitives padded to
    a multiple of 128 so the MXU RHS is lane-dense in VMEM.
    """
    M, D = weight.shape
    Mp = max(_LANES, pl.cdiv(M, _LANES) * _LANES)
    w = weight
    b = bias
    if Mp != M:
        w = jnp.pad(w, ((0, Mp - M), (0, 0)))    # zero rows -> logit 0 (unused)
        b = jnp.pad(b, (0, Mp - M))
    return jnp.transpose(w, (1, 0)), b.reshape(1, Mp), M


def probability_forward(x, w_dmp, b_1mp, n_primitives, *, block_b=8192,
                        vmem_limit_bytes=None):
    """sigmoid(x @ W.T + b) with pre-prepared params.

    x:     [B, D] float32
    w_dmp: [D, Mp] float32  (from prepare_probability_params)
    b_1mp: [1, Mp] float32
    returns [B, n_primitives] float32
    """
    B, D = x.shape
    D_w, Mp = w_dmp.shape
    assert D == D_w, (D, D_w)
    M = n_primitives

    if B <= block_b:
        tb = B                                   # single block == full dim: legal
    else:
        tb = max(_SUBLANES, (block_b // _SUBLANES) * _SUBLANES)

    grid = (pl.cdiv(B, tb),)                     # ragged tail handled by Pallas

    cost = pl.CostEstimate(
        flops=2 * B * D * M,
        transcendentals=B * M,
        bytes_accessed=(B * D + D * Mp + Mp + B * M) * 4,
    )

    return pl.pallas_call(
        _probability_kernel,
        out_shape=jax.ShapeDtypeStruct((B, M), jnp.float32),
        grid=grid,
        in_specs=[
            pl.BlockSpec((tb, D), lambda i: (i, 0)),   # batch-tiled input
            pl.BlockSpec((D, Mp), lambda i: (0, 0)),   # weight resident in VMEM
            pl.BlockSpec((1, Mp), lambda i: (0, 0)),   # bias resident in VMEM
        ],
        out_specs=pl.BlockSpec((tb, M), lambda i: (i, 0)),  # un-padded output
        compiler_params=pltpu.CompilerParams(
            dimension_semantics=("parallel",),          # megacore sharding (v7x)
            vmem_limit_bytes=vmem_limit_bytes,
        ),
        cost_estimate=cost,
    )(x, w_dmp, b_1mp)


def reference_forward(x, weight, bias):
    return jax.nn.sigmoid(x @ weight.T + bias[None, :])


if __name__ == "__main__":
    # Shapes implied by the module: X is [batch, input_dims] -> [batch, n_primitives]
    B, D, M = 2, 32, 8  # batch, input_dims (feature_shape), n_primitives

    key = jax.random.PRNGKey(0)
    kx, kw, kb = jax.random.split(key, 3)

    x = jax.random.normal(kx, (B, D), dtype=jnp.float32)
    # Deterministic init mimicking nn.Linear uniform(-1/sqrt(D), 1/sqrt(D)).
    bound = 1.0 / (D ** 0.5)
    weight = jax.random.uniform(kw, (M, D), minval=-bound, maxval=bound,
                                dtype=jnp.float32)
    bias = jax.random.uniform(kb, (M,), minval=-bound, maxval=bound,
                              dtype=jnp.float32)

    # One-time parameter prep (padded + transposed weight).
    w_dmp, b_1mp, n_prim = prepare_probability_params(weight, bias)

    # Small-shape path (single block).
    probs = jax.block_until_ready(probability_forward(x, w_dmp, b_1mp, n_prim))
    ref = reference_forward(x, weight, bias)
    assert probs.shape == (B, M)
    assert jnp.allclose(probs, ref, atol=1e-5, rtol=1e-5)

    # Multi-block path, batch divisible by the tile.
    B2 = 24
    x2 = jax.random.normal(jax.random.PRNGKey(1), (B2, D), dtype=jnp.float32)
    probs2 = jax.block_until_ready(
        probability_forward(x2, w_dmp, b_1mp, n_prim, block_b=8))
    ref2 = reference_forward(x2, weight, bias)
    assert probs2.shape == (B2, M)
    assert jnp.allclose(probs2, ref2, atol=1e-5, rtol=1e-5)

    # Multi-block path with a ragged tail (no wrapper-side batch padding).
    B3 = 21
    x3 = jax.random.normal(jax.random.PRNGKey(2), (B3, D), dtype=jnp.float32)
    probs3 = jax.block_until_ready(
        probability_forward(x3, w_dmp, b_1mp, n_prim, block_b=8))
    ref3 = reference_forward(x3, weight, bias)
    assert probs3.shape == (B3, M)
    assert jnp.allclose(probs3, ref3, atol=1e-5, rtol=1e-5)

    print("KERNEL_OK")
</pallas_src>

<mosaic_0001>
module attributes {stable_mosaic.version = 11 : i64} {
  func.func @_probability_kernel(%arg0: i32, %arg1: memref<2x32xf32, #tpu.memory_space<vmem>>, %arg2: memref<32x128xf32, #tpu.memory_space<vmem>>, %arg3: memref<1x128xf32, #tpu.memory_space<vmem>>, %arg4: memref<2x8xf32, #tpu.memory_space<vmem>>) attributes {dimension_semantics = [#tpu.dimension_semantics<parallel>], iteration_bounds = array<i64: 1>, scalar_prefetch = 0 : i64, scratch_operands = 0 : i64, tpu.core_type = #tpu.core_type<tc>, window_params = [{transform_indices = @transform_0, window_bounds = array<i64: 2, 32>}, {pipeline_mode = #tpu.pipeline_mode<synchronous>, transform_indices = @transform_1, window_bounds = array<i64: 32, 128>}, {pipeline_mode = #tpu.pipeline_mode<synchronous>, transform_indices = @transform_2, window_bounds = array<i64: 1, 128>}, {transform_indices = @transform_3, window_bounds = array<i64: 2, 8>}]} {
    %c0 = arith.constant 0 : index
    %c0_0 = arith.constant 0 : index
    %0 = vector.load %arg1[%c0, %c0_0] : memref<2x32xf32, #tpu.memory_space<vmem>>, vector<2x32xf32>
    %c0_1 = arith.constant 0 : index
    %c0_2 = arith.constant 0 : index
    %1 = vector.load %arg2[%c0_1, %c0_2] : memref<32x128xf32, #tpu.memory_space<vmem>>, vector<32x128xf32>
    %cst = arith.constant dense<0.000000e+00> : vector<2x128xf32>
    %2 = tpu.matmul %0, %1, %cst {dimension_numbers = #tpu.dot_dimension_numbers<[1], [0], [0], [1], [0, 0, 1, 1], [], []>} : vector<2x32xf32>, vector<32x128xf32>, vector<2x128xf32> -> vector<2x128xf32>
    %c0_3 = arith.constant 0 : index
    %c0_4 = arith.constant 0 : index
    %3 = vector.load %arg3[%c0_3, %c0_4] : memref<1x128xf32, #tpu.memory_space<vmem>>, vector<1x128xf32>
    %4 = vector.broadcast %3 : vector<1x128xf32> to vector<2x128xf32>
    %5 = arith.addf %2, %4 : vector<2x128xf32>
    %6 = vector.extract_strided_slice %5 {offsets = [0, 0], sizes = [2, 8], strides = [1, 1]} : vector<2x128xf32> to vector<2x8xf32>
    %7 = arith.negf %6 : vector<2x8xf32>
    %8 = math.exp %7 : vector<2x8xf32>
    %cst_5 = arith.constant 1.000000e+00 : f32
    %9 = vector.broadcast %cst_5 : f32 to vector<2x8xf32>
    %10 = arith.addf %9, %8 : vector<2x8xf32>
    %11 = arith.divf %9, %10 : vector<2x8xf32>
    %c0_6 = arith.constant 0 : index
    %c0_7 = arith.constant 0 : index
    %12 = vector.load %arg4[%c0_6, %c0_7] : memref<2x8xf32, #tpu.memory_space<vmem>>, vector<2x8xf32>
    tpu.vector_store %arg4[%c0_6, %c0_7], %11 {strides = array<i32>} : memref<2x8xf32, #tpu.memory_space<vmem>>, vector<2x8xf32>,
    return
  }
  func.func @transform_0(%arg0: i32) -> (i32, i32) {
    %c0_i32 = arith.constant 0 : i32
    %c0_i32_0 = arith.constant 0 : i32
    return %arg0, %c0_i32 : i32, i32
  }
  func.func @transform_1(%arg0: i32) -> (i32, i32) {
    %c0_i32 = arith.constant 0 : i32
    %c0_i32_0 = arith.constant 0 : i32
    %c0_i32_1 = arith.constant 0 : i32
    return %c0_i32, %c0_i32_0 : i32, i32
  }
  func.func @transform_2(%arg0: i32) -> (i32, i32) {
    %c0_i32 = arith.constant 0 : i32
    %c0_i32_0 = arith.constant 0 : i32
    %c0_i32_1 = arith.constant 0 : i32
    return %c0_i32, %c0_i32_0 : i32, i32
  }
  func.func @transform_3(%arg0: i32) -> (i32, i32) {
    %c0_i32 = arith.constant 0 : i32
    %c0_i32_0 = arith.constant 0 : i32
    return %arg0, %c0_i32 : i32, i32
  }
}

</mosaic_0001>

<bundles_post_ra>
// kernel: tpu_custom_call.1
= control target key start
LH: loop header
LB: loop body
LE: loop exit
PB: predicated region body
PF: predicated region fallthrough
CT: control target
= control target key end

     0   :  { %8 = vsyncpa [#allocation3], 0  ;;  %s286_s0 = inlined_call_operand.hbm [shape: f32[2,32], index: 0, kind: input, shape index: {}]   ;;  %s287_s1 = inlined_call_operand.hbm [shape: f32[32,128], index: 1, kind: input, shape index: {}]   ;;  %s288_s2 = inlined_call_operand.vmem [shape: f32[1,128], index: 2, kind: input, shape index: {}]   ;;  %s289_s3 = inlined_call_operand.hbm [shape: f32[2,8], index: 3, kind: output, shape index: {}]  }
   0x1   :  { %9 = vsyncpa [#allocation6], 0 }
   0x2   :  { %10 = vsyncpa [#allocation4], 0  ;;  %s247_s12 = smov [#allocation2]   ;;  %s248_s14 = smov [#allocation5]  }
   0x3   :  { %s17_s13 = sshll.u32 %s247_s12, 4  ;;  %s26_s15 = sshll.u32 %s248_s14, 4  ;;  %s18_s13 = int_to_ptr.vmem [resolvable:$true] %s17_s13  ;;  %s27_s15 = int_to_ptr.vmem [resolvable:$true] %s26_s15 }
   0x4   :  { %s189_s16 = scalar_lea.vmem %s18_s13, 32  ;;  %p194_p1 = scmp.lt.s32.totalorder %s18_s13, %s18_s13 }
   0x5   :  { %p190_p0 = scmp.ne.s32.totalorder %s18_s13, %s189_s16  ;;  %p195_p2 = scmp.lt.s32.totalorder %s189_s16, %s189_s16 }
   0x7   :  { %p196_p3 = por %p195_p2, %p194_p1 }
   0x9   :  { %p197_p4 = pnand %p196_p3, %p190_p0 }
   0xb   :  { %200 = shalt.err (!%p197_p4)
}
   0xc   :  { %20 = dma.hbm_to_vmem [thread:$0]  %s286_s0, 32, %s18_s13, [#allocation3]  }
   0xd   :  { %s209_s19 = scalar_lea.vmem %s27_s15, 512  ;;  %p214_p6 = scmp.lt.s32.totalorder %s27_s15, %s27_s15 }
   0xe   :  { %p210_p5 = scmp.ne.s32.totalorder %s27_s15, %s209_s19  ;;  %p215_p7 = scmp.lt.s32.totalorder %s209_s19, %s209_s19 }
  0x10   :  { %p216_p8 = por %p215_p7, %p214_p6 }
  0x12   :  { %p217_p9 = pnand %p216_p8, %p210_p5 }
  0x14   :  { %220 = shalt.err (!%p217_p9)
}
  0x15   :  { %s249_s20 = smov 128   ;;  %s250_s21 = smov 8  }
  0x16   :  { %32 = dma.hbm_to_vmem [thread:$0]  %s287_s1, 512, %s27_s15, [#allocation6], %s249_s20, %s249_s20, %s250_s21  }
  0x17   :  { %241 = dma.done.wait [#allocation3], 32  }
  0x18   :  { %242 = vsyncadd [#allocation3], 4294967264 }
  0x19   :  { %243 = dma.done.wait [#allocation6], 512  }
  0x1a   :  { %244 = vsyncadd [#allocation6], 4294966784  ;;  %v251_v0 = vmov 0.0   ;;  %vm252_vm0 = vmmov 0   ;;  %v45_v1 = vld [vmem:[#allocation5 + $0x18] sm:$0xff]  ;;  %v44_v2 = vld [vmem:[#allocation5 + $0x10] sm:$0xff] }
  0x1b   :  { %159 = vmatprep.subr.mxu0 %v251_v0  ;;  %167 = vmatprep.mubr.msk.f32.mxu0 %vm252_vm0, %v251_v0  ;;  %v43_v3 = vld [vmem:[#allocation5 + $0x8] sm:$0xff]  ;;  %v42_v4 = vld [vmem:[#allocation5] sm:$0xff]  ;;  %v41_v5 = vld [vmem:[#allocation2] sm:$0x3]  ;;  %vm53_vm1 = vcmask 261120   ;;  %s253_s24 = smov [#allocation7]  }
  0x1c   :  { %160 = vmatpush3.msra.mxu0 %v45_v1  ;;  %v151_v6 = vld [vmem:[%s288_s2] ss:$0 sm:$0xff]  ;;  %s141_s25 = sshll.u32 %s253_s24, 4  ;;  %vm133_vm2 = vcmask 58368   ;;  %s142_s25 = int_to_ptr.vmem [resolvable:$true] %s141_s25 }
  0x1d   :  { %161 = vmatprep.subr.mxu0 %v251_v0  ;;  %s221_s26 = scalar_lea.vmem %s142_s25, 32  ;;  %p226_p11 = scmp.lt.s32.totalorder %s142_s25, %s142_s25 }
  0x1e   :  { %162 = vmatpush3.msra.mxu0 %v44_v2  ;;  %p222_p10 = scmp.ne.s32.totalorder %s142_s25, %s221_s26  ;;  %p227_p12 = scmp.lt.s32.totalorder %s221_s26, %s221_s26 }
  0x1f   :  { %163 = vmatprep.subr.mxu0 %v251_v0 }
  0x20   :  { %164 = vmatpush3.msra.mxu0 %v43_v3  ;;  %p228_p13 = por %p227_p12, %p226_p11 }
  0x21   :  { %165 = vmatprep.subr.mxu0 %v251_v0 }
  0x22   :  { %166 = vmatpush3.msra.mxu0 %v42_v4  ;;  %p229_p0 = pnand %p228_p13, %p222_p10 }
  0x23   :  { %168 = vmatmul.mubr.msk.f32.vlgmr.msra.gmra.mxu0 %vm53_vm1, %v41_v5 }
  0xe3   :  { %v123_v7 = vpop.f32.mrf.mxu0 }
  0xe4   :  { %v124_v8 = vadd.f32 %v151_v6, %v123_v7 }
  0xe5   :  { %v169_v9 = vpop.f32.mrf.mxu0 }
  0xe6   :  { %v153_v10 = vmul.f32 -1.442695, %v124_v8 }
  0xe8   :  { %177 = vpow2.f32 %v153_v10 }
  0xf5   :  { %v178_v11 = vpop.eup %177 }
  0xf6   :  { %v130_v12 = vadd.f32 1.0, %v178_v11 }
  0xf8   :  { %179 = vrcp.f32 %v130_v12 }
 0x105   :  { %v180_v13 = vpop.eup %179 }
 0x106   :  { %134 = vst.msk [vmem:[#allocation7] sm:$0x3] %vm133_vm2, %v180_v13 }
 0x107   :  { %232 = shalt.err (!%p229_p0)
}
 0x108   :  { %144 = dma.vmem_to_hbm [thread:$0]  %s142_s25, 32, %s289_s3, [#allocation4]  }
 0x109   :  { %245 = dma.done.wait [#allocation4], 32  }
 0x10a   :  { %246 = vsyncadd [#allocation4], 4294967264 }
 0x10b   :  { %148 = vsyncpa [#allocation3], 1 }
 0x10c   :  { %149 = vsyncpa [#allocation6], 1 }
 0x10d   :  { %150 = vsyncpa [#allocation4], 1 }

</bundles_post_ra>
